<compile_context>
chip_gen: v7x
topology: tpu7x:2x2x1
jax: 0.10.0
libtpu: 0.0.40
codegen_flags: <defaults>
</compile_context>

<pallas_src>
import functools

import jax
import jax.numpy as jnp
from jax.experimental import pallas as pl
from jax.experimental.pallas import tpu as pltpu


def _round_up(x: int, m: int) -> int:
    return ((x + m - 1) // m) * m


def _packed_ce_kernel(logits_ref, tgt_ref, out_ref, *, n_rows):
    """One grid step: partial NLL sum over a (TN, g*C) packed row tile.

    logits_ref: (TN, g*C) packed logits tile (input dtype; upcast in-kernel)
    tgt_ref:    (TN, g)   packed int32 class indices
    out_ref:    (1, 1, 1) f32 per-tile partial sum of -log_softmax[target]
    """
    i = pl.program_id(0)
    x_raw = logits_ref[...].astype(jnp.float32)               # (tn, P)
    tgt = tgt_ref[...]                                         # (tn, g) i32
    tn, p_dim = x_raw.shape
    g = tgt.shape[-1]
    c = p_dim // g

    lane = jax.lax.broadcasted_iota(jnp.int32, (tn, p_dim), 1)
    sub = jax.lax.broadcasted_iota(jnp.int32, (tn, p_dim), 0)

    # Segment (= original row within the pack) of each lane, built with
    # compares/selects only (no integer division).
    seg_masks = []
    lane_seg = jnp.zeros_like(lane)
    for s in range(g):
        m = (lane >= s * c) & (lane < (s + 1) * c)
        seg_masks.append(m)
        if s:
            lane_seg = jnp.where(m, s, lane_seg)
    lane_col = lane - lane_seg * c

    # Global original-row index of every lane.  Rows past the true batch size
    # (g-padding and ragged-last-tile overhang) are zeroed BEFORE exp/log so
    # undefined HBM data can never poison the result with NaN/Inf.
    orig_row = (i * tn + sub) * g + lane_seg
    lane_valid = orig_row < n_rows
    x = jnp.where(lane_valid, x_raw, 0.0)

    # Per-segment max (numerically stable LSE per original row).
    m_full = jnp.zeros_like(x)
    for s in range(g):
        m_s = jnp.max(jnp.where(seg_masks[s], x, -jnp.inf), axis=-1, keepdims=True)
        m_full = jnp.where(seg_masks[s], m_s, m_full)
    shifted = x - m_full                                       # (tn, P)
    p = jnp.exp(shifted)                                       # one dense EUP pass

    # Per-segment sum(exp), stacked into a dense (tn, g) tile -> one log pass.
    seg_id = jax.lax.broadcasted_iota(jnp.int32, (tn, g), 1)
    sub_g = jax.lax.broadcasted_iota(jnp.int32, (tn, g), 0)
    se = jnp.ones((tn, g), jnp.float32)
    for s in range(g):
        se_s = jnp.sum(jnp.where(seg_masks[s], p, 0.0), axis=-1, keepdims=True)
        se = jnp.where(seg_id == s, se_s, se)
    seg_valid = ((i * tn + sub_g) * g + seg_id) < n_rows
    lse_sum = jnp.sum(jnp.where(seg_valid, jnp.log(se), 0.0),
                      axis=-1, keepdims=True)                  # (tn, 1)

    # Fused target gather: one combined masked lane reduction for all segments.
    tgt_lane = jnp.zeros_like(lane)
    for s in range(g):
        tgt_lane = jnp.where(seg_masks[s], tgt[:, s:s + 1], tgt_lane)
    tgt_mask = (lane_col == tgt_lane) & lane_valid
    gathered = jnp.sum(jnp.where(tgt_mask, shifted, 0.0),
                       axis=-1, keepdims=True)                 # (tn, 1)

    # nll per original row = log(sum exp) - (x[target] - m); sum over the tile.
    partial = jnp.sum(lse_sum - gathered, axis=0, keepdims=True)   # (1, 1)
    out_ref[0] = partial


def latex_detection_loss(predicted: jax.Array, target: jax.Array, *, tn: int | None = None) -> jax.Array:
    """predicted: (N, C) logits (any float dtype), target: (N,) int class indices.

    Returns scalar f32 mean cross-entropy == torch.nn.CrossEntropyLoss()(predicted, target).
    """
    n, c = predicted.shape

    # --- small-C lane packing: g original rows per 128-lane row (free reshape) ---
    g = max(1, min(128 // c, 32)) if c < 128 else 1
    n_pad = _round_up(n, g)
    if n_pad != n:
        predicted = jnp.pad(predicted, ((0, n_pad - n), (0, 0)))
        target = jnp.pad(target, ((0, n_pad - n),))
    n_packed = n_pad // g
    p_dim = g * c
    logits_p = predicted.reshape(n_packed, p_dim)              # row-major => bitcast reshape
    tgt_p = target.astype(jnp.int32).reshape(n_packed, g)

    # --- adaptive row tile + explicit VMEM budget (per feedback) ---
    itemsize = jnp.dtype(predicted.dtype).itemsize
    # Per-packed-row VMEM bytes per pipeline buffer: lane-padded logits tile plus
    # the lane-padded (TN, g)->(TN, 128) i32 target tile.
    row_vmem = _round_up(p_dim, 128) * itemsize + 128 * 4
    try:
        vmem_cap = int(pltpu.get_tpu_info().vmem_capacity_bytes)
    except Exception:  # pragma: no cover - conservative fallback (v7x = 64 MiB)
        vmem_cap = 64 * 1024 * 1024
    vmem_budget = min(vmem_cap // 2, 48 * 1024 * 1024)

    if tn is None:
        # ~2 MiB of logits HBM payload per grid step amortises the ~0.35us step cost.
        tn = (2 * 1024 * 1024) // max(p_dim * itemsize, 1)
    tn = min(int(tn), max(8, vmem_budget // (2 * row_vmem)))
    if tn >= n_packed:
        tn = n_packed                       # single full-extent block (always legal)
    else:
        tn = max(8, (tn // 8) * 8)          # (8,128) rule on the sublane dim
    num_tiles = -(-n_packed // tn)

    vmem_limit = int(max(2 * tn * row_vmem + (2 << 20), 16 * 1024 * 1024))

    kernel = functools.partial(_packed_ce_kernel, n_rows=n)

    partials = pl.pallas_call(
        kernel,
        out_shape=jax.ShapeDtypeStruct((num_tiles, 1, 1), jnp.float32),
        grid_spec=pltpu.PrefetchScalarGridSpec(
            num_scalar_prefetch=0,
            grid=(num_tiles,),
            in_specs=[
                pl.BlockSpec((tn, p_dim), lambda i: (i, 0)),   # packed logits row tile
                pl.BlockSpec((tn, g), lambda i: (i, 0)),       # packed target row tile
            ],
            # Each grid step owns its own output block -> no cross-step state,
            # so the axis can be "parallel" (dual-TC on v7x).
            out_specs=pl.BlockSpec((1, 1, 1), lambda i: (i, 0, 0)),
        ),
        compiler_params=pltpu.CompilerParams(
            dimension_semantics=("parallel",),
            vmem_limit_bytes=vmem_limit,
        ),
    )(logits_p, tgt_p)

    # Final (tiny) two-level reduction + mean in plain JAX.
    return jnp.sum(partials) / jnp.float32(n)


if __name__ == "__main__":
    key = jax.random.PRNGKey(0)
    k_logits, k_target = jax.random.split(key)

    # Small synthetic shapes.  N is deliberately NOT a multiple of either the
    # packing factor (g = 128//C = 4) or the explicit row tile, so the host-side
    # pad, the in-kernel validity masking and the per-tile partial outputs are
    # all exercised.
    N, C = 203, 32
    predicted = jax.random.normal(k_logits, (N, C), dtype=jnp.float32)
    target = jax.random.randint(k_target, (N,), 0, C, dtype=jnp.int32)

    # Reference: mean cross-entropy via pure JAX log_softmax.
    ref = -jnp.mean(jax.nn.log_softmax(predicted, axis=-1)[jnp.arange(N), target])

    loss_adaptive = latex_detection_loss(predicted, target)       # adaptive TN, 1 tile
    loss_tiled = latex_detection_loss(predicted, target, tn=16)   # 4 tiles, ragged last
    jax.block_until_ready((loss_adaptive, loss_tiled))

    assert jnp.allclose(loss_adaptive, ref, atol=1e-5, rtol=1e-5), (loss_adaptive, ref)
    assert jnp.allclose(loss_tiled, ref, atol=1e-5, rtol=1e-5), (loss_tiled, ref)

    print("KERNEL_OK")
</pallas_src>

<mosaic_0001>
module attributes {stable_mosaic.version = 11 : i64} {
  func.func @_packed_ce_kernel(%arg0: i32, %arg1: memref<51x128xf32, #tpu.memory_space<vmem>>, %arg2: memref<51x4xi32, #tpu.memory_space<vmem>>, %arg3: memref<1x1x1xf32, #tpu.memory_space<vmem>>) attributes {dimension_semantics = [#tpu.dimension_semantics<parallel>], iteration_bounds = array<i64: 1>, scalar_prefetch = 0 : i64, scratch_operands = 0 : i64, tpu.core_type = #tpu.core_type<tc>, window_params = [{transform_indices = @transform_0, window_bounds = array<i64: 51, 128>}, {transform_indices = @transform_1, window_bounds = array<i64: 51, 4>}, {transform_indices = @transform_2, window_bounds = array<i64: 1, 1, 1>}]} {
    %c0 = arith.constant 0 : index
    %c0_0 = arith.constant 0 : index
    %0 = vector.load %arg1[%c0, %c0_0] : memref<51x128xf32, #tpu.memory_space<vmem>>, vector<51x128xf32>
    %c0_1 = arith.constant 0 : index
    %c0_2 = arith.constant 0 : index
    %1 = vector.load %arg2[%c0_1, %c0_2] : memref<51x4xi32, #tpu.memory_space<vmem>>, vector<51x4xi32>
    %2 = tpu.iota {dimensions = array<i32: 1>} : vector<51x128xi32>
    %3 = tpu.iota {dimensions = array<i32: 0>} : vector<51x128xi32>
    %c0_i32 = arith.constant 0 : i32
    %4 = vector.broadcast %c0_i32 : i32 to vector<51x128xi32>
    %c0_i32_3 = arith.constant 0 : i32
    %5 = vector.broadcast %c0_i32_3 : i32 to vector<51x128xi32>
    %6 = arith.cmpi sge, %2, %5 : vector<51x128xi32>
    %c32_i32 = arith.constant 32 : i32
    %7 = vector.broadcast %c32_i32 : i32 to vector<51x128xi32>
    %8 = arith.cmpi slt, %2, %7 : vector<51x128xi32>
    %9 = arith.andi %6, %8 : vector<51x128xi1>
    %c32_i32_4 = arith.constant 32 : i32
    %10 = vector.broadcast %c32_i32_4 : i32 to vector<51x128xi32>
    %11 = arith.cmpi sge, %2, %10 : vector<51x128xi32>
    %c64_i32 = arith.constant 64 : i32
    %12 = vector.broadcast %c64_i32 : i32 to vector<51x128xi32>
    %13 = arith.cmpi slt, %2, %12 : vector<51x128xi32>
    %14 = arith.andi %11, %13 : vector<51x128xi1>
    %c1_i32 = arith.constant 1 : i32
    %15 = vector.broadcast %c1_i32 : i32 to vector<51x128xi32>
    %16 = arith.select %14, %15, %4 : vector<51x128xi1>, vector<51x128xi32>
    %c64_i32_5 = arith.constant 64 : i32
    %17 = vector.broadcast %c64_i32_5 : i32 to vector<51x128xi32>
    %18 = arith.cmpi sge, %2, %17 : vector<51x128xi32>
    %c96_i32 = arith.constant 96 : i32
    %19 = vector.broadcast %c96_i32 : i32 to vector<51x128xi32>
    %20 = arith.cmpi slt, %2, %19 : vector<51x128xi32>
    %21 = arith.andi %18, %20 : vector<51x128xi1>
    %c2_i32 = arith.constant 2 : i32
    %22 = vector.broadcast %c2_i32 : i32 to vector<51x128xi32>
    %23 = arith.select %21, %22, %16 : vector<51x128xi1>, vector<51x128xi32>
    %c96_i32_6 = arith.constant 96 : i32
    %24 = vector.broadcast %c96_i32_6 : i32 to vector<51x128xi32>
    %25 = arith.cmpi sge, %2, %24 : vector<51x128xi32>
    %c128_i32 = arith.constant 128 : i32
    %26 = vector.broadcast %c128_i32 : i32 to vector<51x128xi32>
    %27 = arith.cmpi slt, %2, %26 : vector<51x128xi32>
    %28 = arith.andi %25, %27 : vector<51x128xi1>
    %c3_i32 = arith.constant 3 : i32
    %29 = vector.broadcast %c3_i32 : i32 to vector<51x128xi32>
    %30 = arith.select %28, %29, %23 : vector<51x128xi1>, vector<51x128xi32>
    %c32_i32_7 = arith.constant 32 : i32
    %31 = vector.broadcast %c32_i32_7 : i32 to vector<51x128xi32>
    %32 = arith.muli %30, %31 : vector<51x128xi32>
    %33 = arith.subi %2, %32 : vector<51x128xi32>
    %c51_i32 = arith.constant 51 : i32
    %34 = arith.muli %arg0, %c51_i32 : i32
    %35 = vector.broadcast %34 : i32 to vector<51x128xi32>
    %36 = arith.addi %35, %3 : vector<51x128xi32>
    %c4_i32 = arith.constant 4 : i32
    %37 = vector.broadcast %c4_i32 : i32 to vector<51x128xi32>
    %38 = arith.muli %36, %37 : vector<51x128xi32>
    %39 = arith.addi %38, %30 : vector<51x128xi32>
    %c203_i32 = arith.constant 203 : i32
    %40 = vector.broadcast %c203_i32 : i32 to vector<51x128xi32>
    %41 = arith.cmpi slt, %39, %40 : vector<51x128xi32>
    %cst = arith.constant 0.000000e+00 : f32
    %42 = vector.broadcast %cst : f32 to vector<51x128xf32>
    %43 = arith.select %41, %0, %42 : vector<51x128xi1>, vector<51x128xf32>
    %cst_8 = arith.constant 0.000000e+00 : f32
    %44 = vector.broadcast %cst_8 : f32 to vector<51x128xf32>
    %cst_9 = arith.constant 0xFF800000 : f32
    %45 = vector.broadcast %cst_9 : f32 to vector<51x128xf32>
    %46 = arith.select %9, %43, %45 : vector<51x128xi1>, vector<51x128xf32>
    %cst_10 = arith.constant dense<0xFF800000> : vector<51xf32>
    %47 = vector.multi_reduction <maximumf>, %46, %cst_10 [1] : vector<51x128xf32> to vector<51xf32>
    %48 = vector.shape_cast %47 : vector<51xf32> to vector<51x1xf32>
    %49 = vector.shape_cast %48 : vector<51x1xf32> to vector<51x1xf32>
    %50 = vector.broadcast %49 : vector<51x1xf32> to vector<51x128xf32>
    %51 = arith.select %9, %50, %44 : vector<51x128xi1>, vector<51x128xf32>
    %cst_11 = arith.constant 0xFF800000 : f32
    %52 = vector.broadcast %cst_11 : f32 to vector<51x128xf32>
    %53 = arith.select %14, %43, %52 : vector<51x128xi1>, vector<51x128xf32>
    %cst_12 = arith.constant dense<0xFF800000> : vector<51xf32>
    %54 = vector.multi_reduction <maximumf>, %53, %cst_12 [1] : vector<51x128xf32> to vector<51xf32>
    %55 = vector.shape_cast %54 : vector<51xf32> to vector<51x1xf32>
    %56 = vector.shape_cast %55 : vector<51x1xf32> to vector<51x1xf32>
    %57 = vector.broadcast %56 : vector<51x1xf32> to vector<51x128xf32>
    %58 = arith.select %14, %57, %51 : vector<51x128xi1>, vector<51x128xf32>
    %cst_13 = arith.constant 0xFF800000 : f32
    %59 = vector.broadcast %cst_13 : f32 to vector<51x128xf32>
    %60 = arith.select %21, %43, %59 : vector<51x128xi1>, vector<51x128xf32>
    %cst_14 = arith.constant dense<0xFF800000> : vector<51xf32>
    %61 = vector.multi_reduction <maximumf>, %60, %cst_14 [1] : vector<51x128xf32> to vector<51xf32>
    %62 = vector.shape_cast %61 : vector<51xf32> to vector<51x1xf32>
    %63 = vector.shape_cast %62 : vector<51x1xf32> to vector<51x1xf32>
    %64 = vector.broadcast %63 : vector<51x1xf32> to vector<51x128xf32>
    %65 = arith.select %21, %64, %58 : vector<51x128xi1>, vector<51x128xf32>
    %cst_15 = arith.constant 0xFF800000 : f32
    %66 = vector.broadcast %cst_15 : f32 to vector<51x128xf32>
    %67 = arith.select %28, %43, %66 : vector<51x128xi1>, vector<51x128xf32>
    %cst_16 = arith.constant dense<0xFF800000> : vector<51xf32>
    %68 = vector.multi_reduction <maximumf>, %67, %cst_16 [1] : vector<51x128xf32> to vector<51xf32>
    %69 = vector.shape_cast %68 : vector<51xf32> to vector<51x1xf32>
    %70 = vector.shape_cast %69 : vector<51x1xf32> to vector<51x1xf32>
    %71 = vector.broadcast %70 : vector<51x1xf32> to vector<51x128xf32>
    %72 = arith.select %28, %71, %65 : vector<51x128xi1>, vector<51x128xf32>
    %73 = arith.subf %43, %72 : vector<51x128xf32>
    %74 = math.exp %73 : vector<51x128xf32>
    %75 = tpu.iota {dimensions = array<i32: 1>} : vector<51x4xi32>
    %76 = tpu.iota {dimensions = array<i32: 0>} : vector<51x4xi32>
    %cst_17 = arith.constant 1.000000e+00 : f32
    %77 = vector.broadcast %cst_17 : f32 to vector<51x4xf32>
    %cst_18 = arith.constant 0.000000e+00 : f32
    %78 = vector.broadcast %cst_18 : f32 to vector<51x128xf32>
    %79 = arith.select %9, %74, %78 : vector<51x128xi1>, vector<51x128xf32>
    %cst_19 = arith.constant dense<0.000000e+00> : vector<51xf32>
    %80 = vector.multi_reduction <add>, %79, %cst_19 [1] : vector<51x128xf32> to vector<51xf32>
    %81 = vector.shape_cast %80 : vector<51xf32> to vector<51x1xf32>
    %c0_i32_20 = arith.constant 0 : i32
    %82 = vector.broadcast %c0_i32_20 : i32 to vector<51x4xi32>
    %83 = arith.cmpi eq, %75, %82 : vector<51x4xi32>
    %84 = vector.shape_cast %81 : vector<51x1xf32> to vector<51x1xf32>
    %85 = vector.broadcast %84 : vector<51x1xf32> to vector<51x4xf32>
    %86 = arith.select %83, %85, %77 : vector<51x4xi1>, vector<51x4xf32>
    %cst_21 = arith.constant 0.000000e+00 : f32
    %87 = vector.broadcast %cst_21 : f32 to vector<51x128xf32>
    %88 = arith.select %14, %74, %87 : vector<51x128xi1>, vector<51x128xf32>
    %cst_22 = arith.constant dense<0.000000e+00> : vector<51xf32>
    %89 = vector.multi_reduction <add>, %88, %cst_22 [1] : vector<51x128xf32> to vector<51xf32>
    %90 = vector.shape_cast %89 : vector<51xf32> to vector<51x1xf32>
    %c1_i32_23 = arith.constant 1 : i32
    %91 = vector.broadcast %c1_i32_23 : i32 to vector<51x4xi32>
    %92 = arith.cmpi eq, %75, %91 : vector<51x4xi32>
    %93 = vector.shape_cast %90 : vector<51x1xf32> to vector<51x1xf32>
    %94 = vector.broadcast %93 : vector<51x1xf32> to vector<51x4xf32>
    %95 = arith.select %92, %94, %86 : vector<51x4xi1>, vector<51x4xf32>
    %cst_24 = arith.constant 0.000000e+00 : f32
    %96 = vector.broadcast %cst_24 : f32 to vector<51x128xf32>
    %97 = arith.select %21, %74, %96 : vector<51x128xi1>, vector<51x128xf32>
    %cst_25 = arith.constant dense<0.000000e+00> : vector<51xf32>
    %98 = vector.multi_reduction <add>, %97, %cst_25 [1] : vector<51x128xf32> to vector<51xf32>
    %99 = vector.shape_cast %98 : vector<51xf32> to vector<51x1xf32>
    %c2_i32_26 = arith.constant 2 : i32
    %100 = vector.broadcast %c2_i32_26 : i32 to vector<51x4xi32>
    %101 = arith.cmpi eq, %75, %100 : vector<51x4xi32>
    %102 = vector.shape_cast %99 : vector<51x1xf32> to vector<51x1xf32>
    %103 = vector.broadcast %102 : vector<51x1xf32> to vector<51x4xf32>
    %104 = arith.select %101, %103, %95 : vector<51x4xi1>, vector<51x4xf32>
    %cst_27 = arith.constant 0.000000e+00 : f32
    %105 = vector.broadcast %cst_27 : f32 to vector<51x128xf32>
    %106 = arith.select %28, %74, %105 : vector<51x128xi1>, vector<51x128xf32>
    %cst_28 = arith.constant dense<0.000000e+00> : vector<51xf32>
    %107 = vector.multi_reduction <add>, %106, %cst_28 [1] : vector<51x128xf32> to vector<51xf32>
    %108 = vector.shape_cast %107 : vector<51xf32> to vector<51x1xf32>
    %c3_i32_29 = arith.constant 3 : i32
    %109 = vector.broadcast %c3_i32_29 : i32 to vector<51x4xi32>
    %110 = arith.cmpi eq, %75, %109 : vector<51x4xi32>
    %111 = vector.shape_cast %108 : vector<51x1xf32> to vector<51x1xf32>
    %112 = vector.broadcast %111 : vector<51x1xf32> to vector<51x4xf32>
    %113 = arith.select %110, %112, %104 : vector<51x4xi1>, vector<51x4xf32>
    %c51_i32_30 = arith.constant 51 : i32
    %114 = arith.muli %arg0, %c51_i32_30 : i32
    %115 = vector.broadcast %114 : i32 to vector<51x4xi32>
    %116 = arith.addi %115, %76 : vector<51x4xi32>
    %c4_i32_31 = arith.constant 4 : i32
    %117 = vector.broadcast %c4_i32_31 : i32 to vector<51x4xi32>
    %118 = arith.muli %116, %117 : vector<51x4xi32>
    %119 = arith.addi %118, %75 : vector<51x4xi32>
    %c203_i32_32 = arith.constant 203 : i32
    %120 = vector.broadcast %c203_i32_32 : i32 to vector<51x4xi32>
    %121 = arith.cmpi slt, %119, %120 : vector<51x4xi32>
    %122 = math.log %113 : vector<51x4xf32>
    %cst_33 = arith.constant 0.000000e+00 : f32
    %123 = vector.broadcast %cst_33 : f32 to vector<51x4xf32>
    %124 = arith.select %121, %122, %123 : vector<51x4xi1>, vector<51x4xf32>
    %cst_34 = arith.constant dense<0.000000e+00> : vector<51xf32>
    %125 = vector.multi_reduction <add>, %124, %cst_34 [1] : vector<51x4xf32> to vector<51xf32>
    %126 = vector.shape_cast %125 : vector<51xf32> to vector<51x1xf32>
    %c0_i32_35 = arith.constant 0 : i32
    %127 = vector.broadcast %c0_i32_35 : i32 to vector<51x128xi32>
    %128 = vector.extract_strided_slice %1 {offsets = [0, 0], sizes = [51, 1], strides = [1, 1]} : vector<51x4xi32> to vector<51x1xi32>
    %129 = vector.shape_cast %128 : vector<51x1xi32> to vector<51x1xi32>
    %130 = vector.broadcast %129 : vector<51x1xi32> to vector<51x128xi32>
    %131 = arith.select %9, %130, %127 : vector<51x128xi1>, vector<51x128xi32>
    %132 = vector.extract_strided_slice %1 {offsets = [0, 1], sizes = [51, 1], strides = [1, 1]} : vector<51x4xi32> to vector<51x1xi32>
    %133 = vector.shape_cast %132 : vector<51x1xi32> to vector<51x1xi32>
    %134 = vector.broadcast %133 : vector<51x1xi32> to vector<51x128xi32>
    %135 = arith.select %14, %134, %131 : vector<51x128xi1>, vector<51x128xi32>
    %136 = vector.extract_strided_slice %1 {offsets = [0, 2], sizes = [51, 1], strides = [1, 1]} : vector<51x4xi32> to vector<51x1xi32>
    %137 = vector.shape_cast %136 : vector<51x1xi32> to vector<51x1xi32>
    %138 = vector.broadcast %137 : vector<51x1xi32> to vector<51x128xi32>
    %139 = arith.select %21, %138, %135 : vector<51x128xi1>, vector<51x128xi32>
    %140 = vector.extract_strided_slice %1 {offsets = [0, 3], sizes = [51, 1], strides = [1, 1]} : vector<51x4xi32> to vector<51x1xi32>
    %141 = vector.shape_cast %140 : vector<51x1xi32> to vector<51x1xi32>
    %142 = vector.broadcast %141 : vector<51x1xi32> to vector<51x128xi32>
    %143 = arith.select %28, %142, %139 : vector<51x128xi1>, vector<51x128xi32>
    %144 = arith.cmpi eq, %33, %143 : vector<51x128xi32>
    %145 = arith.andi %144, %41 : vector<51x128xi1>
    %cst_36 = arith.constant 0.000000e+00 : f32
    %146 = vector.broadcast %cst_36 : f32 to vector<51x128xf32>
    %147 = arith.select %145, %73, %146 : vector<51x128xi1>, vector<51x128xf32>
    %cst_37 = arith.constant dense<0.000000e+00> : vector<51xf32>
    %148 = vector.multi_reduction <add>, %147, %cst_37 [1] : vector<51x128xf32> to vector<51xf32>
    %149 = vector.shape_cast %148 : vector<51xf32> to vector<51x1xf32>
    %150 = arith.subf %126, %149 : vector<51x1xf32>
    %cst_38 = arith.constant dense<0.000000e+00> : vector<1xf32>
    %151 = vector.multi_reduction <add>, %150, %cst_38 [0] : vector<51x1xf32> to vector<1xf32>
    %152 = vector.shape_cast %151 : vector<1xf32> to vector<1x1xf32>
    %c0_39 = arith.constant 0 : index
    %c0_40 = arith.constant 0 : index
    %c0_41 = arith.constant 0 : index
    %153 = vector.load %arg3[%c0_39, %c0_40, %c0_41] : memref<1x1x1xf32, #tpu.memory_space<vmem>>, vector<1x1x1xf32>
    %154 = vector.shape_cast %153 : vector<1x1x1xf32> to vector<1x1xf32>
    %155 = vector.shape_cast %152 : vector<1x1xf32> to vector<1x1x1xf32>
    tpu.vector_store %arg3[%c0_39, %c0_40, %c0_41], %155 {strides = array<i32>} : memref<1x1x1xf32, #tpu.memory_space<vmem>>, vector<1x1x1xf32>,
    return
  }
  func.func @transform_0(%arg0: i32) -> (i32, i32) {
    %c0_i32 = arith.constant 0 : i32
    %c0_i32_0 = arith.constant 0 : i32
    return %arg0, %c0_i32 : i32, i32
  }
  func.func @transform_1(%arg0: i32) -> (i32, i32) {
    %c0_i32 = arith.constant 0 : i32
    %c0_i32_0 = arith.constant 0 : i32
    return %arg0, %c0_i32 : i32, i32
  }
  func.func @transform_2(%arg0: i32) -> (i32, i32, i32) {
    %c0_i32 = arith.constant 0 : i32
    %c0_i32_0 = arith.constant 0 : i32
    %c0_i32_1 = arith.constant 0 : i32
    return %arg0, %c0_i32, %c0_i32_0 : i32, i32, i32
  }
}

</mosaic_0001>

<bundles_post_ra>
// kernel: tpu_custom_call.1
= control target key start
LH: loop header
LB: loop body
LE: loop exit
PB: predicated region body
PF: predicated region fallthrough
CT: control target
= control target key end

     0   :  { %v26_v0 = vlaneseq  ;;  %v668_v1 = vmov 0   ;;  %s1389_s0 = inlined_call_operand.vmem [shape: f32[51,128], index: 0, kind: input, shape index: {}]   ;;  %s1390_s1 = inlined_call_operand.vmem [shape: s32[51,4], index: 1, kind: input, shape index: {}]   ;;  %s1391_s2 = inlined_call_operand.hbm [shape: f32[1,1,1], index: 2, kind: output, shape index: {}]  }
   0x1   :  { %595 = vset.pattern.permute.xlu1 %v668_v1  ;;  %596 = vset.pattern.permute.xlu0 %v668_v1 }
   0x2   :  { %v690_v2 = vand.u32 127, %v26_v0  ;;  %v692_v3 = vshrl.u32 %v26_v0, 7 }
   0x3   :  { %7 = vsyncpa [#allocation3], 0  ;;  %v12_v14 = vld [vmem:[%s1389_s0] sm:$0xff]  ;;  %v13_v16 = vld [vmem:[%s1389_s0 + $0x8] sm:$0xff]  ;;  %vm109_vm15 = vcmask 1042432  }
   0x4   :  { %vm39_vm0 = vcmp.ge.s32.totalorder %v690_v2, 32  ;;  %vm40_vm1 = vcmp.lt.s32.totalorder %v690_v2, 64  ;;  %vm43_vm2 = vcmp.ge.s32.totalorder %v690_v2, 64  ;;  %vm44_vm3 = vcmp.lt.s32.totalorder %v690_v2, 96  ;;  %v14_v23 = vld [vmem:[%s1389_s0 + $0x10] sm:$0xff]  ;;  %v15_v35 = vld [vmem:[%s1389_s0 + $0x18] sm:$0xff] }
   0x5   :  { %vm698_vm4 = vmand %vm39_vm0, %vm40_vm1  ;;  %vm47_vm5 = vcmp.ge.s32.totalorder %v690_v2, 96  ;;  %v62_v5 = vmul.u32 4, %v692_v3  ;;  %v705_v6 = vadd.s32 8, %v692_v3  ;;  %v715_v9 = vadd.s32 16, %v692_v3  ;;  %v16_v46 = vld [vmem:[%s1389_s0 + $0x20] sm:$0xff]  ;;  %v17_v57 = vld [vmem:[%s1389_s0 + $0x28] sm:$0xff] }
   0x6   :  { %v42_v7 = vsel %vm698_vm4, 1, %v668_v1  ;;  %vm710_vm6 = vmand %vm43_vm2, %vm44_vm3  ;;  %vm37_vm7 = vcmp.lt.s32.totalorder %v690_v2, 32  ;;  %v768_v24 = vadd.s32 24, %v692_v3  ;;  %v793_v32 = vadd.s32 32, %v692_v3  ;;  %v18_v53 = vld [vmem:[%s1389_s0 + $0x30] sm:$0x7] }
   0x7   :  { %v46_v10 = vsel %vm710_vm6, 2, %v42_v7  ;;  %v63_v11 = vmul.u32 4, %v705_v6  ;;  %v64_v13 = vmul.u32 4, %v715_v9  ;;  %v807_v37 = vadd.s32 48, %v692_v3 }
   0x8   :  { %v722_v12 = vsel %vm47_vm5, 3, %v46_v10  ;;  %v65_v28 = vmul.u32 4, %v768_v24  ;;  %v66_v36 = vmul.u32 4, %v793_v32  ;;  %v825_v42 = vadd.s32 40, %v692_v3 }
   0x9   :  { %v731_v15 = vadd.s32 %v62_v5, %v722_v12  ;;  %v739_v17 = vadd.s32 %v63_v11, %v722_v12  ;;  %v745_v18 = vadd.s32 %v64_v13, %v722_v12  ;;  %v68_v43 = vmul.u32 4, %v807_v37 }
   0xa   :  { %v790_v31 = vadd.s32 %v65_v28, %v722_v12  ;;  %v822_v41 = vadd.s32 %v66_v36, %v722_v12  ;;  %v67_v47 = vmul.u32 4, %v825_v42  ;;  %v350_v3 = vadd.s32 %v64_v13, %v690_v2 }
   0xb   :  { %vm76_vm8 = vcmp.lt.s32.totalorder %v731_v15, 203  ;;  %vm77_vm9 = vcmp.lt.s32.totalorder %v739_v17, 203  ;;  %vm78_vm10 = vcmp.lt.s32.totalorder %v745_v18, 203  ;;  %v842_v48 = vadd.s32 %v68_v43, %v722_v12 }
   0xc   :  { %v751_v19 = vsel %vm76_vm8, %v12_v14, 0.0  ;;  %v755_v20 = vsel %vm77_vm9, %v13_v16, 0.0  ;;  %v778_v27 = vsel %vm78_vm10, %v14_v23, 0.0  ;;  %vm79_vm11 = vcmp.lt.s32.totalorder %v790_v31, 203 }
   0xd   :  { %v120_v21 = vsel %vm698_vm4, %v751_v19, -inf  ;;  %v90_v22 = vsel %vm37_vm7, %v751_v19, -inf  ;;  %v121_v25 = vsel %vm698_vm4, %v755_v20, -inf  ;;  %v91_v26 = vsel %vm37_vm7, %v755_v20, -inf }
   0xe   :  { %127 = vmax.xlane.f32.xlu1 %v120_v21  ;;  %97 = vmax.xlane.f32.xlu0 %v90_v22  ;;  %v149_v29 = vsel %vm710_vm6, %v751_v19, -inf  ;;  %v92_v30 = vsel %vm37_vm7, %v778_v27, -inf  ;;  %v122_v33 = vsel %vm698_vm4, %v778_v27, -inf  ;;  %v150_v34 = vsel %vm710_vm6, %v755_v20, -inf }
   0xf   :  { %v179_v38 = vsel %vm47_vm5, %v755_v20, -inf  ;;  %v178_v39 = vsel %vm47_vm5, %v751_v19, -inf  ;;  %v817_v40 = vsel %vm79_vm11, %v15_v35, 0.0  ;;  %v151_v44 = vsel %vm710_vm6, %v778_v27, -inf  ;;  %v931_v35 = vld [vmem:[%s1390_s1 + $0x18] sm:$0xff] }
  0x10   :  { %v93_v45 = vsel %vm37_vm7, %v817_v40, -inf  ;;  %vm80_vm12 = vcmp.lt.s32.totalorder %v822_v41, 203  ;;  %v180_v49 = vsel %vm47_vm5, %v778_v27, -inf  ;;  %v123_v50 = vsel %vm698_vm4, %v817_v40, -inf }
  0x11   :  { %v852_v51 = vsel %vm80_vm12, %v16_v46, 0.0  ;;  %v857_v52 = vadd.s32 %v67_v47, %v722_v12  ;;  %vm82_vm13 = vcmp.lt.s32.totalorder %v842_v48, 203  ;;  %v152_v54 = vsel %vm710_vm6, %v817_v40, -inf  ;;  %v954_v46 = vld [vmem:[%s1390_s1 + $0x20] sm:$0xff] }
  0x12   :  { %129 = vmax.xlane.f32.xlu1 %v121_v25  ;;  %99 = vmax.xlane.f32.xlu0 %v91_v26  ;;  %v94_v55 = vsel %vm37_vm7, %v852_v51, -inf  ;;  %v871_v56 = vsel %vm82_vm13, %v18_v53, 0.0  ;;  %v181_v58 = vsel %vm47_vm5, %v817_v40, -inf  ;;  %v124_v59 = vsel %vm698_vm4, %v852_v51, -inf }
  0x13   :  { %vm81_vm14 = vcmp.lt.s32.totalorder %v857_v52, 203  ;;  %v96_v60 = vsel %vm37_vm7, %v871_v56, -inf  ;;  %v153_v7 = vsel %vm710_vm6, %v852_v51, -inf  ;;  %v126_v10 = vsel %vm698_vm4, %v871_v56, -inf }
  0x14   :  { %v888_v61 = vsel %vm81_vm14, %v17_v57, 0.0  ;;  %v110_v62 = vsel %vm109_vm15, %v96_v60, -inf  ;;  %v182_v14 = vsel %vm47_vm5, %v852_v51, -inf  ;;  %v139_v16 = vsel %vm109_vm15, %v126_v10, -inf }
  0x15   :  { %v95_v63 = vsel %vm37_vm7, %v888_v61, -inf  ;;  %v125_v0 = vsel %vm698_vm4, %v888_v61, -inf  ;;  %v155_v21 = vsel %vm710_vm6, %v871_v56, -inf  ;;  %v154_v23 = vsel %vm710_vm6, %v888_v61, -inf }
  0x16   :  { %156 = vmax.xlane.f32.xlu1 %v149_v29  ;;  %101 = vmax.xlane.f32.xlu0 %v92_v30  ;;  %v168_v22 = vsel %vm109_vm15, %v155_v21, -inf  ;;  %v184_v25 = vsel %vm47_vm5, %v871_v56, -inf  ;;  %v183_v29 = vsel %vm47_vm5, %v888_v61, -inf  ;;  %v19_v30 = vld [vmem:[%s1390_s1] sm:$0xff]  ;;  %v354_v42 = vadd.s32 %v68_v43, %v690_v2 }
  0x17   :  { %v197_v26 = vsel %vm109_vm15, %v184_v25, -inf }
  0x1a   :  { %131 = vmax.xlane.f32.xlu1 %v122_v33  ;;  %158 = vmax.xlane.f32.xlu0 %v150_v34  ;;  %v669_v33 = vmov 1   ;;  %v20_v34 = vld [vmem:[%s1390_s1 + $0x8] sm:$0xff] }
  0x1e   :  { %187 = vmax.xlane.f32.xlu1 %v179_v38  ;;  %185 = vmax.xlane.f32.xlu0 %v178_v39  ;;  %v937_v38 = vld [vmem:[%s1390_s1 + $0x28] sm:$0xff]  ;;  %v21_v39 = vld [vmem:[%s1390_s1 + $0x10] sm:$0xff] }
  0x22   :  { %160 = vmax.xlane.f32.xlu1 %v151_v44  ;;  %103 = vmax.xlane.f32.xlu0 %v93_v45  ;;  %v670_v44 = vmov 2   ;;  %v671_v45 = vmov 3  }
  0x26   :  { %189 = vmax.xlane.f32.xlu1 %v180_v49  ;;  %133 = vmax.xlane.f32.xlu0 %v123_v50 }
  0x2a   :  { %162 = vmax.xlane.f32.xlu1 %v152_v54  ;;  %105 = vmax.xlane.f32.xlu0 %v94_v55 }
  0x2e   :  { %191 = vmax.xlane.f32.xlu1 %v181_v58  ;;  %135 = vmax.xlane.f32.xlu0 %v124_v59 }
  0x32   :  { %111 = vmax.xlane.f32.xlu1 %v110_v62  ;;  %107 = vmax.xlane.f32.xlu0 %v95_v63 }
  0x36   :  { %137 = vmax.xlane.f32.xlu1 %v125_v0  ;;  %164 = vmax.xlane.f32.xlu0 %v153_v7 }
  0x3a   :  { %193 = vmax.xlane.f32.xlu1 %v182_v14  ;;  %140 = vmax.xlane.f32.xlu0 %v139_v16 }
  0x3e   :  { %169 = vmax.xlane.f32.xlu1 %v168_v22  ;;  %166 = vmax.xlane.f32.xlu0 %v154_v23 }
  0x42   :  { %198 = vmax.xlane.f32.xlu1 %v197_v26  ;;  %195 = vmax.xlane.f32.xlu0 %v183_v29 }
  0x53   :  { %407 = vperm.xlu1 %595, %v19_v30  }
  0x57   :  { %597 = vset.pattern.permute.xlu1 %v669_v33 }
  0x58   :  { %435 = vperm.xlu1 %597, %v19_v30   ;;  %410 = vperm.xlu0 %596, %v20_v34  }
  0x5c   :  { %438 = vperm.xlu1 %597, %v20_v34   ;;  %416 = vperm.xlu0 %596, %v931_v35  }
  0x60   :  { %598 = vset.pattern.permute.xlu1 %v668_v1  ;;  %422 = vperm.xlu0 %596, %v937_v38  }
  0x61   :  { %413 = vperm.xlu1 %598, %v21_v39  }
  0x64   :  { %607 = vset.pattern.permute.xlu0 %v669_v33 }
  0x65   :  { %599 = vset.pattern.permute.xlu1 %v670_v44  ;;  %444 = vperm.xlu0 %607, %v931_v35  }
  0x66   :  { %463 = vperm.xlu1 %599, %v19_v30  }
  0x6a   :  { %466 = vperm.xlu1 %599, %v20_v34  }
  0x6e   :  { %600 = vset.pattern.permute.xlu1 %v669_v33 }
  0x6f   :  { %441 = vperm.xlu1 %600, %v21_v39  }
  0x73   :  { %601 = vset.pattern.permute.xlu1 %v671_v45 }
  0x74   :  { %491 = vperm.xlu1 %601, %v19_v30  }
  0x78   :  { %494 = vperm.xlu1 %601, %v20_v34  }
  0x7c   :  { %602 = vset.pattern.permute.xlu1 %v670_v44 }
  0x7d   :  { %469 = vperm.xlu1 %602, %v21_v39  }
  0x81   :  { %603 = vset.pattern.permute.xlu1 %v671_v45 }
  0x82   :  { %497 = vperm.xlu1 %603, %v21_v39  }
  0x86   :  { %604 = vset.pattern.permute.xlu1 %v668_v1 }
  0x87   :  { %419 = vperm.xlu1 %604, %v954_v46  }
  0x8b   :  { %605 = vset.pattern.permute.xlu1 %v669_v33 }
  0x8c   :  { %447 = vperm.xlu1 %605, %v954_v46  }
  0x90   :  { %606 = vset.pattern.permute.xlu1 %v671_v45 }
  0x91   :  { %500 = vperm.xlu1 %606, %v931_v35  }
  0x95   :  { %608 = vset.pattern.permute.xlu1 %v668_v1 }
  0x9b   :  { %v128_v49 = vpop.xlane.xlu1 %127  ;;  %v98_v50 = vpop.xlane.xlu0 %97 }
  0x9c   :  { %v113_v58 = vsel %vm37_vm7, %v98_v50, 0.0 }
  0x9d   :  { %v142_v63 = vsel %vm698_vm4, %v128_v49, %v113_v58 }
  0x9f   :  { %v130_v53 = vpop.xlane.xlu1 %129  ;;  %v100_v54 = vpop.xlane.xlu0 %99 }
  0xa0   :  { %v114_v59 = vsel %vm37_vm7, %v100_v54, 0.0 }
  0xa1   :  { %v143_v1 = vsel %vm698_vm4, %v130_v53, %v114_v59 }
  0xa3   :  { %v157_v55 = vpop.xlane.xlu1 %156  ;;  %v102_v57 = vpop.xlane.xlu0 %101 }
  0xa4   :  { %v171_v0 = vsel %vm710_vm6, %v157_v55, %v142_v63  ;;  %v115_v34 = vsel %vm37_vm7, %v102_v57, 0.0 }
  0xa7   :  { %v132_v60 = vpop.xlane.xlu1 %131  ;;  %v159_v62 = vpop.xlane.xlu0 %158 }
  0xa8   :  { %v172_v7 = vsel %vm710_vm6, %v159_v62, %v143_v1  ;;  %v144_v39 = vsel %vm698_vm4, %v132_v60, %v115_v34 }
  0xab   :  { %v188_v10 = vpop.xlane.xlu1 %187  ;;  %v186_v14 = vpop.xlane.xlu0 %185 }
  0xac   :  { %v201_v16 = vsel %vm47_vm5, %v188_v10, %v172_v7  ;;  %v200_v21 = vsel %vm47_vm5, %v186_v14, %v171_v0 }
  0xad   :  { %v980_v22 = vsub.f32 %v755_v20, %v201_v16  ;;  %v983_v23 = vsub.f32 %v751_v19, %v200_v21 }
  0xaf   :  { %v216_v25 = vmul.f32 1.442695, %v980_v22  ;;  %v214_v26 = vmul.f32 1.442695, %v983_v23  ;;  %v161_v29 = vpop.xlane.xlu1 %160  ;;  %v104_v30 = vpop.xlane.xlu0 %103 }
  0xb0   :  { %v173_v20 = vsel %vm710_vm6, %v161_v29, %v144_v39  ;;  %v116_v58 = vsel %vm37_vm7, %v104_v30, 0.0 }
  0xb1   :  { %616 = vpow2.f32 %v216_v25 }
  0xb2   :  { %618 = vpow2.f32 %v214_v26 }
  0xb3   :  { %v190_v49 = vpop.xlane.xlu1 %189  ;;  %v134_v19 = vpop.xlane.xlu0 %133 }
  0xb4   :  { %v202_v50 = vsel %vm47_vm5, %v190_v49, %v173_v20  ;;  %v145_v59 = vsel %vm698_vm4, %v134_v19, %v116_v58 }
  0xb5   :  { %v996_v53 = vsub.f32 %v778_v27, %v202_v50 }
  0xb7   :  { %v218_v54 = vmul.f32 1.442695, %v996_v53  ;;  %v163_v55 = vpop.xlane.xlu1 %162  ;;  %v106_v57 = vpop.xlane.xlu0 %105 }
  0xb8   :  { %v174_v62 = vsel %vm710_vm6, %v163_v55, %v145_v59  ;;  %v117_v34 = vsel %vm37_vm7, %v106_v57, 0.0 }
  0xb9   :  { %620 = vpow2.f32 %v218_v54 }
  0xbb   :  { %v1003_v60 = vpop.eup %616  ;;  %v192_v63 = vpop.xlane.xlu1 %191 }
  0xbc   :  { %v136_v1 = vpop.xlane.xlu0 %135  ;;  %v1007_v27 = vpop.eup %618  ;;  %v203_v0 = vsel %vm47_vm5, %v192_v63, %v174_v62  ;;  %v229_v7 = vsel %vm37_vm7, %v1003_v60, 0.0 }
  0xbd   :  { %v1015_v10 = vsub.f32 %v817_v40, %v203_v0  ;;  %237 = vadd.xlane.f32.xlu1 %v229_v7  ;;  %v228_v14 = vsel %vm37_vm7, %v1007_v27, 0.0  ;;  %v146_v39 = vsel %vm698_vm4, %v136_v1, %v117_v34 }
  0xbe   :  { %235 = vadd.xlane.f32.xlu0 %v228_v14 }
  0xbf   :  { %v220_v16 = vmul.f32 1.442695, %v1015_v10  ;;  %v112_v21 = vpop.xlane.xlu1 %111 }
  0xc0   :  { %v108_v25 = vpop.xlane.xlu0 %107 }
  0xc1   :  { %622 = vpow2.f32 %v220_v16  ;;  %v118_v63 = vsel %vm37_vm7, %v108_v25, 0.0 }
  0xc3   :  { %v1021_v26 = vpop.eup %620  ;;  %v138_v29 = vpop.xlane.xlu1 %137 }
  0xc4   :  { %v165_v30 = vpop.xlane.xlu0 %164  ;;  %v230_v40 = vsel %vm37_vm7, %v1021_v26, 0.0  ;;  %v147_v1 = vsel %vm698_vm4, %v138_v29, %v118_v63 }
  0xc5   :  { %239 = vadd.xlane.f32.xlu0 %v230_v40  ;;  %v175_v20 = vsel %vm710_vm6, %v165_v30, %v146_v39 }
  0xc7   :  { %v194_v49 = vpop.xlane.xlu1 %193 }
  0xc8   :  { %v141_v19 = vpop.xlane.xlu0 %140  ;;  %v204_v50 = vsel %vm47_vm5, %v194_v49, %v175_v20  ;;  %v119_v49 = vsel %vm37_vm7, %v112_v21, 0.0 }
  0xc9   :  { %v1035_v54 = vsub.f32 %v852_v51, %v204_v50 }
  0xcb   :  { %v623_v55 = vpop.eup %622  ;;  %v222_v58 = vmul.f32 1.442695, %v1035_v54  ;;  %v170_v59 = vpop.xlane.xlu1 %169 }
  0xcc   :  { %v167_v57 = vpop.xlane.xlu0 %166  ;;  %v231_v62 = vsel %vm37_vm7, %v623_v55, 0.0  ;;  %v261_v50 = vsel %vm698_vm4, %v623_v55, 0.0 }
  0xcd   :  { %624 = vpow2.f32 %v222_v58  ;;  %241 = vadd.xlane.f32.xlu1 %v231_v62  ;;  %v176_v51 = vsel %vm710_vm6, %v167_v57, %v147_v1  ;;  %v148_v62 = vsel %vm698_vm4, %v141_v19, %v119_v49  ;;  %v288_v19 = vsel %vm710_vm6, %v1007_v27, 0.0 }
  0xce   :  { %v177_v63 = vsel %vm710_vm6, %v170_v59, %v148_v62  ;;  %v260_v59 = vsel %vm698_vm4, %v1021_v26, 0.0  ;;  %v319_v62 = vsel %vm47_vm5, %v1003_v60, 0.0 }
  0xcf   :  { %v199_v0 = vpop.xlane.xlu1 %198 }
  0xd0   :  { %v196_v7 = vpop.xlane.xlu0 %195  ;;  %v206_v21 = vsel %vm47_vm5, %v199_v0, %v177_v63  ;;  %v291_v63 = vsel %vm710_vm6, %v623_v55, 0.0 }
  0xd1   :  { %v205_v14 = vsel %vm47_vm5, %v196_v7, %v176_v51  ;;  %v258_v51 = vsel %vm698_vm4, %v1007_v27, 0.0 }
  0xd2   :  { %v1049_v16 = vsub.f32 %v888_v61, %v205_v14  ;;  %v259_v61 = vsel %vm698_vm4, %v1003_v60, 0.0  ;;  %v1088_v14 = vsub.f32 %v871_v56, %v206_v21  ;;  %v321_v21 = vsel %vm47_vm5, %v623_v55, 0.0 }
  0xd3   :  { %v1052_v40 = vpop.permute.xlu1 %407 }
  0xd4   :  { %v224_v30 = vmul.f32 1.442695, %v1049_v16 }
  0xd6   :  { %626 = vpow2.f32 %v224_v30  ;;  %v226_v30 = vmul.f32 1.442695, %v1088_v14 }
  0xd7   :  { %v1054_v25 = vpop.eup %624  ;;  %v1056_v34 = vpop.permute.xlu1 %435 }
  0xd8   :  { %v232_v29 = vsel %vm37_vm7, %v1054_v25, 0.0  ;;  %v262_v56 = vsel %vm698_vm4, %v1054_v25, 0.0  ;;  %628 = vpow2.f32 %v226_v30  ;;  %v292_v49 = vsel %vm710_vm6, %v1054_v25, 0.0 }
  0xd9   :  { %243 = vadd.xlane.f32.xlu0 %v232_v29  ;;  %v290_v29 = vsel %vm710_vm6, %v1021_v26, 0.0  ;;  %v318_v30 = vsel %vm47_vm5, %v1007_v27, 0.0  ;;  %v322_v27 = vsel %vm47_vm5, %v1054_v25, 0.0 }
  0xdb   :  { %v1061_v39 = vpop.permute.xlu1 %438 }
  0xdd   :  { %267 = vadd.xlane.f32.xlu0 %v259_v61 }
  0xe0   :  { %v627_v20 = vpop.eup %626  ;;  %v1070_v58 = vpop.permute.xlu1 %413 }
  0xe1   :  { %271 = vadd.xlane.f32.xlu0 %v261_v50  ;;  %v233_v57 = vsel %vm37_vm7, %v627_v20, 0.0  ;;  %v263_v1 = vsel %vm698_vm4, %v627_v20, 0.0  ;;  %v289_v50 = vsel %vm710_vm6, %v1003_v60, 0.0  ;;  %v323_v60 = vsel %vm47_vm5, %v627_v20, 0.0 }
  0xe2   :  { %245 = vadd.xlane.f32.xlu1 %v233_v57 }
  0xe5   :  { %275 = vadd.xlane.f32.xlu0 %v263_v1  ;;  %v1085_v7 = vpop.permute.xlu1 %463 }
  0xe6   :  { %265 = vadd.xlane.f32.xlu1 %v258_v51  ;;  %v293_v51 = vsel %vm710_vm6, %v627_v20, 0.0 }
  0xe9   :  { %295 = vadd.xlane.f32.xlu0 %v288_v19  ;;  %v1096_v0 = vpop.permute.xlu1 %466  ;;  %v629_v19 = vpop.eup %628 }
  0xea   :  { %269 = vadd.xlane.f32.xlu1 %v260_v59 }
  0xed   :  { %299 = vadd.xlane.f32.xlu0 %v290_v29  ;;  %v234_v29 = vsel %vm37_vm7, %v629_v19, 0.0 }
  0xee   :  { %273 = vadd.xlane.f32.xlu1 %v262_v56  ;;  %v1105_v61 = vpop.permute.xlu1 %441  ;;  %v247_v55 = vsel %vm109_vm15, %v234_v29, 0.0  ;;  %v320_v56 = vsel %vm47_vm5, %v1021_v26, 0.0  ;;  %v25_v29 = vld [vmem:[%s1390_s1 + $0x30] sm:$0x7]  ;;  %s672_s1 = smov [#allocation2]  }
  0xef   :  { %s582_s8 = sshll.u32 %s672_s1, 4  ;;  %s583_s8 = int_to_ptr.vmem [resolvable:$true] %s582_s8 }
  0xf0   :  { %s644_s9 = scalar_lea.vmem %s583_s8, 16  ;;  %s648_s10 = scalar_lea.vmem %s583_s8, 32 }
  0xf1   :  { %303 = vadd.xlane.f32.xlu0 %v292_v49  ;;  %v294_v49 = vsel %vm710_vm6, %v629_v19, 0.0  ;;  %p645_p0 = scmp.ne.s32.totalorder %s583_s8, %s644_s9  ;;  %p649_p1 = scmp.lt.s32.totalorder %s583_s8, %s583_s8 }
  0xf2   :  { %297 = vadd.xlane.f32.xlu1 %v289_v50  ;;  %v307_v50 = vsel %vm109_vm15, %v294_v49, 0.0  ;;  %p650_p2 = scmp.lt.s32.totalorder %s648_s10, %s644_s9 }
  0xf3   :  { %v492_v57 = vpop.permute.xlu1 %491 }
  0xf4   :  { %p651_p3 = por %p650_p2, %p649_p1 }
  0xf5   :  { %327 = vadd.xlane.f32.xlu0 %v319_v62  ;;  %v264_v62 = vsel %vm698_vm4, %v629_v19, 0.0 }
  0xf6   :  { %301 = vadd.xlane.f32.xlu1 %v291_v63  ;;  %p652_p4 = pnand %p651_p3, %p645_p0 }
  0xf7   :  { %v1118_v1 = vpop.permute.xlu1 %494 }
  0xf9   :  { %331 = vadd.xlane.f32.xlu0 %v321_v21  ;;  %v277_v21 = vsel %vm109_vm15, %v264_v62, 0.0 }
  0xfa   :  { %305 = vadd.xlane.f32.xlu1 %v293_v51  ;;  %v324_v51 = vsel %vm47_vm5, %v629_v19, 0.0  ;;  %v51_v19 = vmul.u32 32, %v722_v12 }
  0xfc   :  { %v1124_v59 = vpop.permute.xlu1 %469 }
  0xfd   :  { %335 = vadd.xlane.f32.xlu0 %v323_v60 }
  0xfe   :  { %325 = vadd.xlane.f32.xlu1 %v318_v30  ;;  %v337_v30 = vsel %vm109_vm15, %v324_v51, 0.0 }
 0x101   :  { %248 = vadd.xlane.f32.xlu0 %v247_v55  ;;  %v498_v20 = vpop.permute.xlu1 %497 }
 0x102   :  { %329 = vadd.xlane.f32.xlu1 %v320_v56 }
 0x105   :  { %308 = vadd.xlane.f32.xlu0 %v307_v50 }
 0x106   :  { %333 = vadd.xlane.f32.xlu1 %v322_v27  ;;  %v420_v63 = vpop.permute.xlu1 %419 }
 0x107   :  { %v1148_v26 = vsel %vm37_vm7, %v420_v63, 0 }
 0x10a   :  { %278 = vadd.xlane.f32.xlu1 %v277_v21 }
 0x10b   :  { %v1152_v60 = vpop.permute.xlu1 %447 }
 0x10c   :  { %v459_v25 = vsel %vm698_vm4, %v1152_v60, %v1148_v26 }
 0x10e   :  { %338 = vadd.xlane.f32.xlu1 %v337_v30 }
 0x110   :  { %v1230_v50 = vpop.permute.xlu1 %500 }
 0x11b   :  { %450 = vperm.xlu0 %607, %v937_v38  }
 0x11f   :  { %425 = vperm.xlu1 %608, %v25_v29   ;;  %610 = vset.pattern.permute.xlu0 %v670_v44 }
 0x120   :  { %472 = vperm.xlu0 %610, %v931_v35   ;;  %v427_v35 = vsel %vm37_vm7, %v1052_v40, 0 }
 0x123   :  { %609 = vset.pattern.permute.xlu1 %v670_v44 }
 0x124   :  { %475 = vperm.xlu1 %609, %v954_v46   ;;  %478 = vperm.xlu0 %610, %v937_v38  }
 0x128   :  { %611 = vset.pattern.permute.xlu1 %v669_v33  ;;  %615 = vset.pattern.permute.xlu0 %v671_v45  ;;  %v455_v33 = vsel %vm698_vm4, %v1056_v34, %v427_v35 }
 0x129   :  { %453 = vperm.xlu1 %611, %v25_v29   ;;  %509 = vperm.xlu0 %615, %v25_v29  }
 0x12d   :  { %612 = vset.pattern.permute.xlu1 %v671_v45 }
 0x12e   :  { %503 = vperm.xlu1 %612, %v954_v46   ;;  %v483_v46 = vsel %vm710_vm6, %v1085_v7, %v455_v33  ;;  %v429_v7 = vsel %vm37_vm7, %v1070_v58, 0 }
 0x12f   :  { %v511_v40 = vsel %vm47_vm5, %v492_v57, %v483_v46 }
 0x132   :  { %613 = vset.pattern.permute.xlu1 %v670_v44  ;;  %v1186_v44 = vsub.s32 %v690_v2, %v51_v19 }
 0x133   :  { %481 = vperm.xlu1 %613, %v25_v29  }
 0x134   :  { %vm518_vm0 = vcmp.eq.s32.totalorder %v1186_v44, %v511_v40 }
 0x135   :  { %vm525_vm1 = vmand %vm518_vm0, %vm76_vm8 }
 0x137   :  { %614 = vset.pattern.permute.xlu1 %v671_v45  ;;  %v411_v45 = vpop.permute.xlu0 %410 }
 0x138   :  { %506 = vperm.xlu1 %614, %v937_v38   ;;  %v532_v38 = vsel %vm525_vm1, %v983_v23, 0.0  ;;  %v428_v12 = vsel %vm37_vm7, %v411_v45, 0  ;;  %v457_v23 = vsel %vm698_vm4, %v1105_v61, %v429_v7  ;;  %vm280_vm1 = vcmp.eq.s32.totalorder %v690_v2, 1 }
 0x139   :  { %v456_v34 = vsel %vm698_vm4, %v1061_v39, %v428_v12  ;;  %v485_v39 = vsel %vm710_vm6, %v1124_v59, %v457_v23 }
 0x13a   :  { %v484_v15 = vsel %vm710_vm6, %v1096_v0, %v456_v34  ;;  %v513_v58 = vsel %vm47_vm5, %v498_v20, %v485_v39 }
 0x13b   :  { %v1202_v57 = vpop.permute.xlu0 %416  ;;  %v512_v55 = vsel %vm47_vm5, %v1118_v1, %v484_v15  ;;  %vm520_vm8 = vcmp.eq.s32.totalorder %v1186_v44, %v513_v58 }
 0x13c   :  { %vm519_vm2 = vcmp.eq.s32.totalorder %v1186_v44, %v512_v55  ;;  %vm527_vm0 = vmand %vm520_vm8, %vm78_vm10  ;;  %vm310_vm10 = vcmp.eq.s32.totalorder %v690_v2, 2  ;;  %vm383_vm8 = vcmask 31744   ;;  %v430_v13 = vsel %vm37_vm7, %v1202_v57, 0 }
 0x13d   :  { %vm526_vm3 = vmand %vm519_vm2, %vm77_vm9  ;;  %v534_v59 = vsel %vm527_vm0, %v996_v53, 0.0  ;;  %vm250_vm9 = vcmp.eq.s32.totalorder %v690_v2, 0  ;;  %vm340_vm2 = vcmp.eq.s32.totalorder %v690_v2, 3  ;;  %vm357_vm0 = vcmp.lt.s32.totalorder %v350_v3, 203 }
 0x13e   :  { %v533_v61 = vsel %vm526_vm3, %v980_v22, 0.0 }
 0x13f   :  { %v1216_v56 = vpop.permute.xlu0 %422 }
 0x140   :  { %v432_v41 = vsel %vm37_vm7, %v1216_v56, 0 }
 0x143   :  { %v1224_v0 = vpop.permute.xlu0 %444 }
 0x144   :  { %v458_v57 = vsel %vm698_vm4, %v1224_v0, %v430_v13  ;;  %v353_v0 = vadd.s32 %v67_v47, %v690_v2 }
 0x148   :  { %539 = vadd.xlane.f32.xlu0 %v532_v38 }
 0x14a   :  { %v238_v17 = vpop.xlane.xlu1 %237 }
 0x14b   :  { %v236_v1 = vpop.xlane.xlu0 %235 }
 0x14c   :  { %v251_v38 = vsel %vm250_vm9, %v236_v1, 1.0 }
 0x152   :  { %v240_v49 = vpop.xlane.xlu0 %239 }
 0x153   :  { %v253_v1 = vsel %vm250_vm9, %v240_v49, 1.0 }
 0x15a   :  { %v242_v62 = vpop.xlane.xlu1 %241 }
 0x15b   :  { %v254_v12 = vsel %vm250_vm9, %v242_v62, 1.0 }
 0x15c   :  { %541 = vadd.xlane.f32.xlu1 %v533_v61 }
 0x160   :  { %543 = vadd.xlane.f32.xlu1 %v534_v59  ;;  %v252_v59 = vsel %vm250_vm9, %v238_v17, 1.0 }
 0x166   :  { %v244_v20 = vpop.xlane.xlu0 %243 }
 0x167   :  { %v255_v17 = vsel %vm250_vm9, %v244_v20, 1.0 }
 0x16a   :  { %v268_v27 = vpop.xlane.xlu0 %267 }
 0x16e   :  { %v272_v63 = vpop.xlane.xlu0 %271 }
 0x16f   :  { %v246_v21 = vpop.xlane.xlu1 %245  ;;  %v284_v34 = vsel %vm280_vm1, %v272_v63, %v254_v12  ;;  %v282_v63 = vsel %vm280_vm1, %v268_v27, %v252_v59 }
 0x172   :  { %v276_v51 = vpop.xlane.xlu0 %275 }
 0x173   :  { %v266_v30 = vpop.xlane.xlu1 %265 }
 0x174   :  { %v281_v7 = vsel %vm280_vm1, %v266_v30, %v251_v38 }
 0x176   :  { %v296_v22 = vpop.xlane.xlu0 %295 }
 0x177   :  { %v270_v29 = vpop.xlane.xlu1 %269  ;;  %v311_v23 = vsel %vm310_vm10, %v296_v22, %v281_v7 }
 0x178   :  { %v283_v62 = vsel %vm280_vm1, %v270_v29, %v253_v1  ;;  %v256_v29 = vsel %vm250_vm9, %v246_v21, 1.0  ;;  %v348_v21 = vadd.s32 %v62_v5, %v690_v2 }
 0x17a   :  { %v300_v35 = vpop.xlane.xlu0 %299  ;;  %vm355_vm3 = vcmp.lt.s32.totalorder %v348_v21, 203 }
 0x17b   :  { %v274_v18 = vpop.xlane.xlu1 %273  ;;  %v313_v30 = vsel %vm310_vm10, %v300_v35, %v283_v62  ;;  %v286_v35 = vsel %vm280_vm1, %v276_v51, %v256_v29  ;;  %v352_v62 = vadd.s32 %v66_v36, %v690_v2 }
 0x17e   :  { %v304_v33 = vpop.xlane.xlu0 %303 }
 0x17f   :  { %v298_v19 = vpop.xlane.xlu1 %297 }
 0x182   :  { %v328_v46 = vpop.xlane.xlu0 %327 }
 0x183   :  { %v302_v53 = vpop.xlane.xlu1 %301 }
 0x184   :  { %v314_v55 = vsel %vm310_vm10, %v302_v53, %v284_v34  ;;  %v312_v53 = vsel %vm310_vm10, %v298_v19, %v282_v63  ;;  %v285_v19 = vsel %vm280_vm1, %v274_v18, %v255_v17 }
 0x185   :  { %v342_v27 = vsel %vm340_vm2, %v328_v46, %v312_v53  ;;  %v315_v38 = vsel %vm310_vm10, %v304_v33, %v285_v19 }
 0x186   :  { %v332_v40 = vpop.xlane.xlu0 %331 }
 0x187   :  { %v306_v45 = vpop.xlane.xlu1 %305  ;;  %v344_v58 = vsel %vm340_vm2, %v332_v40, %v314_v55 }
 0x188   :  { %v316_v12 = vsel %vm310_vm10, %v306_v45, %v286_v35 }
 0x18a   :  { %v336_v15 = vpop.xlane.xlu0 %335 }
 0x18b   :  { %v326_v39 = vpop.xlane.xlu1 %325  ;;  %v346_v46 = vsel %vm340_vm2, %v336_v15, %v316_v12 }
 0x18c   :  { %v341_v61 = vsel %vm340_vm2, %v326_v39, %v311_v23  ;;  %v351_v23 = vadd.s32 %v65_v28, %v690_v2 }
 0x18d   :  { %630 = vlog2.f32 %v341_v61 }
 0x18e   :  { %632 = vlog2.f32 %v344_v58  ;;  %v249_v40 = vpop.xlane.xlu0 %248 }
 0x18f   :  { %v330_v22 = vpop.xlane.xlu1 %329  ;;  %v257_v33 = vsel %vm250_vm9, %v249_v40, 1.0  ;;  %vm358_vm9 = vcmp.lt.s32.totalorder %v351_v23, 203 }
 0x190   :  { %v343_v49 = vsel %vm340_vm2, %v330_v22, %v313_v30  ;;  %v349_v22 = vadd.s32 %v63_v11, %v690_v2 }
 0x191   :  { %634 = vlog2.f32 %v343_v49 }
 0x192   :  { %636 = vlog2.f32 %v342_v27  ;;  %v309_v18 = vpop.xlane.xlu0 %308 }
 0x193   :  { %v334_v20 = vpop.xlane.xlu1 %333 }
 0x194   :  { %v345_v51 = vsel %vm340_vm2, %v334_v20, %v315_v38 }
 0x195   :  { %638 = vlog2.f32 %v345_v51 }
 0x196   :  { %640 = vlog2.f32 %v346_v46 }
 0x197   :  { %v631_v34 = vpop.eup %630  ;;  %v279_v45 = vpop.xlane.xlu1 %278 }
 0x198   :  { %v287_v5 = vsel %vm280_vm1, %v279_v45, %v257_v33  ;;  %v363_v7 = vmul.f32 0.6931472, %v631_v34  ;;  %v633_v15 = vpop.eup %632 }
 0x199   :  { %v317_v1 = vsel %vm310_vm10, %v309_v18, %v287_v5  ;;  %v369_v59 = vmul.f32 0.6931472, %v633_v15  ;;  %vm359_vm10 = vcmp.lt.s32.totalorder %v352_v62, 203 }
 0x19a   :  { %v1297_v55 = vpop.permute.xlu0 %450  ;;  %v376_v39 = vsel %vm355_vm3, %v363_v7, 0.0 }
 0x19b   :  { %v635_v58 = vpop.eup %634  ;;  %v339_v61 = vpop.xlane.xlu1 %338  ;;  %v384_v9 = vsel %vm383_vm8, %v376_v39, 0.0  ;;  %v379_v36 = vsel %vm358_vm9, %v369_v59, 0.0  ;;  %vm402_vm9 = vcmask 26624  }
 0x19c   :  { %v347_v24 = vsel %vm340_vm2, %v339_v61, %v317_v1  ;;  %385 = vadd.xlane.f32.xlu0 %v384_v9  ;;  %v367_v28 = vmul.f32 0.6931472, %v635_v58  ;;  %v637_v63 = vpop.eup %636  ;;  %vm356_vm2 = vcmp.lt.s32.totalorder %v349_v22, 203  ;;  %v393_v19 = vsel %vm383_vm8, %v379_v36, 0.0 }
 0x19d   :  { %642 = vlog2.f32 %v347_v24  ;;  %v365_v11 = vmul.f32 0.6931472, %v637_v63 }
 0x19e   :  { %v378_v30 = vsel %vm357_vm0, %v367_v28, 0.0  ;;  %vm360_vm0 = vcmp.lt.s32.totalorder %v353_v0, 203 }
 0x19f   :  { %v639_v53 = vpop.eup %638  ;;  %v426_v49 = vpop.permute.xlu1 %425  ;;  %v390_v40 = vsel %vm383_vm8, %v378_v30, 0.0  ;;  %v377_v20 = vsel %vm356_vm2, %v365_v11, 0.0 }
 0x1a0   :  { %v473_v17 = vpop.permute.xlu0 %472  ;;  %391 = vadd.xlane.f32.xlu0 %v390_v40  ;;  %v371_v29 = vmul.f32 0.6931472, %v639_v53  ;;  %v641_v27 = vpop.eup %640  ;;  %v387_v31 = vsel %vm383_vm8, %v377_v20, 0.0  ;;  %v433_v5 = vsel %vm37_vm7, %v426_v49, 0 }
 0x1a1   :  { %v486_v32 = vsel %vm710_vm6, %v473_v17, %v458_v57 }
 0x1a2   :  { %v514_v6 = vsel %vm47_vm5, %v1230_v50, %v486_v32  ;;  %v380_v12 = vsel %vm359_vm10, %v371_v29, 0.0  ;;  %v373_v50 = vmul.f32 0.6931472, %v641_v27 }
 0x1a3   :  { %vm521_vm1 = vcmp.eq.s32.totalorder %v1186_v44, %v514_v6  ;;  %v476_v35 = vpop.permute.xlu1 %475  ;;  %v396_v21 = vsel %vm383_vm8, %v380_v12, 0.0 }
 0x1a4   :  { %vm528_vm3 = vmand %vm521_vm1, %vm79_vm11  ;;  %394 = vadd.xlane.f32.xlu0 %v393_v19  ;;  %v381_v51 = vsel %vm360_vm0, %v373_v50, 0.0  ;;  %vm361_vm11 = vcmp.lt.s32.totalorder %v354_v42, 203  ;;  %v487_v37 = vsel %vm710_vm6, %v476_v35, %v459_v25  ;;  %v479_v43 = vpop.permute.xlu0 %478 }
 0x1a5   :  { %v535_v38 = vsel %vm528_vm3, %v1015_v10, 0.0  ;;  %v399_v10 = vsel %vm383_vm8, %v381_v51, 0.0 }
 0x1a6   :  { %545 = vadd.xlane.f32.xlu1 %v535_v38 }
 0x1a7   :  { %v643_v47 = vpop.eup %642 }
 0x1a8   :  { %v454_v46 = vpop.permute.xlu1 %453  ;;  %397 = vadd.xlane.f32.xlu0 %v396_v21  ;;  %v375_v18 = vmul.f32 0.6931472, %v643_v47  ;;  %v510_v60 = vpop.permute.xlu0 %509 }
 0x1a9   :  { %v461_v25 = vsel %vm698_vm4, %v454_v46, %v433_v5 }
 0x1aa   :  { %388 = vadd.xlane.f32.xlu1 %v387_v31  ;;  %v382_v34 = vsel %vm361_vm11, %v375_v18, 0.0 }
 0x1ab   :  { %v403_v3 = vsel %vm402_vm9, %v382_v34, 0.0 }
 0x1ac   :  { %400 = vadd.xlane.f32.xlu0 %v399_v10 }
 0x1ad   :  { %v504_v33 = vpop.permute.xlu1 %503 }
 0x1ae   :  { %v515_v45 = vsel %vm47_vm5, %v504_v33, %v487_v37 }
 0x1af   :  { %vm522_vm10 = vcmp.eq.s32.totalorder %v1186_v44, %v515_v45 }
 0x1b0   :  { %404 = vadd.xlane.f32.xlu0 %v403_v3  ;;  %vm529_vm8 = vmand %vm522_vm10, %vm80_vm12 }
 0x1b1   :  { %v536_v26 = vsel %vm529_vm8, %v1035_v54, 0.0  ;;  %v460_v54 = vsel %vm698_vm4, %v1297_v55, %v432_v41  ;;  %vm574_vm4 = vcmask 0  }
 0x1b2   :  { %v482_v7 = vpop.permute.xlu1 %481  ;;  %547 = vadd.xlane.f32.xlu1 %v536_v26  ;;  %v488_v39 = vsel %vm710_vm6, %v479_v43, %v460_v54 }
 0x1b3   :  { %v489_v15 = vsel %vm710_vm6, %v482_v7, %v461_v25 }
 0x1b4   :  { %v517_v23 = vsel %vm47_vm5, %v510_v60, %v489_v15 }
 0x1b5   :  { %vm524_vm12 = vcmp.eq.s32.totalorder %v1186_v44, %v517_v23 }
 0x1b6   :  { %vm531_vm2 = vmand %vm524_vm12, %vm82_vm13 }
 0x1b7   :  { %v507_v58 = vpop.permute.xlu1 %506  ;;  %v538_v56 = vsel %vm531_vm2, %v1088_v14, 0.0 }
 0x1b8   :  { %v516_v61 = vsel %vm47_vm5, %v507_v58, %v488_v39  ;;  %v551_v8 = vsel %vm109_vm15, %v538_v56, 0.0 }
 0x1b9   :  { %vm523_vm1 = vcmp.eq.s32.totalorder %v1186_v44, %v516_v61 }
 0x1ba   :  { %vm530_vm7 = vmand %vm523_vm1, %vm81_vm14 }
 0x1bb   :  { %v537_v4 = vsel %vm530_vm7, %v1049_v16, 0.0 }
 0x1bc   :  { %549 = vadd.xlane.f32.xlu1 %v537_v4 }
 0x1c0   :  { %552 = vadd.xlane.f32.xlu1 %v551_v8 }
 0x1d5   :  { %v540_v55 = vpop.xlane.xlu0 %539 }
 0x1e9   :  { %v542_v1 = vpop.xlane.xlu1 %541 }
 0x1ed   :  { %v544_v9 = vpop.xlane.xlu1 %543 }
 0x229   :  { %v386_v2 = vpop.xlane.xlu0 %385 }
 0x22a   :  { %v554_v59 = vsub.f32 %v386_v2, %v540_v55 }
 0x22d   :  { %v392_v13 = vpop.xlane.xlu0 %391 }
 0x22e   :  { %v556_v63 = vsub.f32 %v392_v13, %v544_v9 }
 0x231   :  { %v395_v24 = vpop.xlane.xlu0 %394 }
 0x233   :  { %v546_v44 = vpop.xlane.xlu1 %545 }
 0x234   :  { %v557_v14 = vsub.f32 %v395_v24, %v546_v44 }
 0x235   :  { %v398_v52 = vpop.xlane.xlu0 %397 }
 0x237   :  { %v389_v48 = vpop.xlane.xlu1 %388 }
 0x238   :  { %v555_v28 = vsub.f32 %v389_v48, %v542_v1 }
 0x239   :  { %v401_v22 = vpop.xlane.xlu0 %400 }
 0x23a   :  { %v561_v62 = vadd.f32 %v555_v28, %v554_v59 }
 0x23c   :  { %v562_v30 = vadd.f32 %v561_v62, %v556_v63 }
 0x23d   :  { %v405_v17 = vpop.xlane.xlu0 %404 }
 0x23e   :  { %v563_v49 = vadd.f32 %v562_v30, %v557_v14 }
 0x23f   :  { %v548_v16 = vpop.xlane.xlu1 %547 }
 0x240   :  { %v558_v53 = vsub.f32 %v398_v52, %v548_v16 }
 0x242   :  { %v564_v32 = vadd.f32 %v563_v49, %v558_v53 }
 0x249   :  { %v550_v57 = vpop.xlane.xlu1 %549 }
 0x24a   :  { %v559_v40 = vsub.f32 %v401_v22, %v550_v57 }
 0x24c   :  { %v565_v27 = vadd.f32 %v564_v32, %v559_v40 }
 0x24d   :  { %v553_v36 = vpop.xlane.xlu1 %552 }
 0x24e   :  { %v560_v29 = vsub.f32 %v405_v17, %v553_v36 }
 0x250   :  { %v566_v6 = vsel %vm109_vm15, %v560_v29, 0.0 }
 0x251   :  { %v567_v11 = vadd.f32 %v566_v6, %v565_v27 }
 0x253   :  { %v568_v0 = vrot.slane %v567_v11, 4 }
 0x255   :  { %v569_v35 = vadd.f32 %v568_v0, %v567_v11 }
 0x257   :  { %v570_v19 = vrot.slane %v569_v35, 2 }
 0x259   :  { %v571_v38 = vadd.f32 %v570_v19, %v569_v35 }
 0x25b   :  { %v572_v12 = vrot.slane %v571_v38, 1 }
 0x25d   :  { %v573_v50 = vadd.f32 %v572_v12, %v571_v38 }
 0x25f   :  { %575 = vst.msk [vmem:[#allocation2] sm:$0x1] %vm574_vm4, %v573_v50 }
 0x260   :  { %655 = shalt.err (!%p652_p4)
}
 0x261   :  { %s656_s13 = scalar_lea.hbm %s1391_s2, 16 }
 0x262   :  { %p657_p5 = scmp.ne.s32.totalorder %s1391_s2, %s656_s13  ;;  %p660_p6 = scmp.lt.u32.totalorder %s656_s13, %s1391_s2 }
 0x264   :  { %p662_p7 = pnand %p660_p6, %p657_p5 }
 0x266   :  { %665 = shalt.err (!%p662_p7)
}
 0x267   :  { %585 = dma.vmem_to_hbm [thread:$0]  %s583_s8, 16, %s1391_s2, [#allocation3]  }
 0x268   :  { %666 = dma.done.wait [#allocation3], 16  }
 0x269   :  { %667 = vsyncadd [#allocation3], 4294967280 }
 0x26a   :  { %589 = vsyncpa [#allocation3], 1 }

</bundles_post_ra>
